<compile_context>
chip_gen: v5e
topology: v5e:2x2
jax: 0.10.0
libtpu: 0.0.40
codegen_flags: <defaults>
</compile_context>

<pallas_src>
import jax
import jax.numpy as jnp
from jax import lax
from jax.experimental import pallas as pl
from jax.experimental.pallas import tpu as pltpu

EPS = 1e-8


def make_temporal_block_kernel(TM, K, B, H, P, dilation, padding, mxu_dtype):
    """One grid step processes TM batch samples laid out as (B, N), N = TM*K."""
    N = TM * K
    pad = padding
    inv_n = 1.0 / float(H * K)      # gLN normalizes over (channels, time) per sample

    def kernel(alpha_ref, x_ref, w1_ref, w2_ref, cp_ref, mask_ref,
               o_ref, ypad_ref, dwn_ref):
        # ---- hoisted parameter loads (once per grid step) ----
        a1 = alpha_ref[0]
        a2 = alpha_ref[1]
        w1 = w1_ref[...]                           # (H, B)   conv1x1
        w2 = w2_ref[...]                           # (B, H)   pointwise conv
        cp = cp_ref[...]                           # (H, 4+P) [g1 b1 g2 b2 wd]
        g1, b1 = cp[:, 0:1], cp[:, 1:2]
        g2, b2 = cp[:, 2:3], cp[:, 3:4]
        masks = mask_ref[...] if TM > 1 else None  # (P, N) tap validity masks

        x2d = x_ref[0].astype(jnp.float32)         # (B, N), lane-dense

        # ---- 1x1 conv (B -> H): ONE MXU dot for the whole batch tile ----
        y = jnp.dot(w1.astype(mxu_dtype), x2d.astype(mxu_dtype),
                    preferred_element_type=jnp.float32)          # (H, N)
        y = jnp.where(y > 0, y, a1 * y)            # PReLU #1 (scalar alpha)

        # Zero the global edge pads of the depthwise scratch (NaN hygiene for
        # the masked tap reads).
        if pad > 0:
            zedge = jnp.zeros((H, pad), jnp.float32)
            ypad_ref[:, 0:pad] = zedge
            ypad_ref[:, pad + N:pad + N + pad] = zedge

        # ---- gLN #1: fused per-sample stats (sum + sum-sq, var clamped), the
        #      normalized result is written straight into the padded scratch.
        for m in range(TM):
            y_m = y[:, m * K:(m + 1) * K]                        # (H, K)
            s = jnp.sum(y_m)
            ss = jnp.sum(y_m * y_m)
            mean = s * inv_n
            var = jnp.maximum(ss * inv_n - mean * mean, 0.0)
            inv_std = lax.rsqrt(var + EPS)
            scale = g1 * inv_std                                  # (H, 1)
            shift = b1 - mean * scale
            ypad_ref[:, pad + m * K:pad + (m + 1) * K] = y_m * scale + shift

        # ---- depthwise dilated conv (groups=H): batched shifted slices of the
        #      padded scratch; per-tap masks zero the cross-sample bleed.
        dw = None
        for p in range(P):
            off = p * dilation
            term = ypad_ref[:, off:off + N] * cp[:, 4 + p:5 + p]
            if TM > 1 and off != pad:              # shift-0 tap needs no mask
                term = term * masks[p:p + 1, :]
            dw = term if dw is None else dw + term

        dw = jnp.where(dw > 0, dw, a2 * dw)        # PReLU #2

        # ---- gLN #2 (same fused per-sample pattern); normalized result goes
        #      to a plain (H, N) scratch so the pointwise conv is one dot.
        for m in range(TM):
            d_m = dw[:, m * K:(m + 1) * K]
            s = jnp.sum(d_m)
            ss = jnp.sum(d_m * d_m)
            mean = s * inv_n
            var = jnp.maximum(ss * inv_n - mean * mean, 0.0)
            inv_std = lax.rsqrt(var + EPS)
            scale = g2 * inv_std
            shift = b2 - mean * scale
            dwn_ref[:, m * K:(m + 1) * K] = d_m * scale + shift

        # ---- pointwise conv (H -> B), batched, + residual; lane-dense store --
        out = jnp.dot(w2.astype(mxu_dtype), dwn_ref[...].astype(mxu_dtype),
                      preferred_element_type=jnp.float32) + x2d
        o_ref[0] = out.astype(o_ref.dtype)

    return kernel


def _pick_batch_tile(M, B, H, K, padding):
    """Default TM: >= 2 grid steps (v7x has 2 TensorCores) and keep the
    per-step live set around <= 24 MiB (fits v7x's 64 MiB VMEM with headroom)."""
    per_sample = 4 * (4 * B * K + 10 * H * K + 2 * H * padding)
    tm = max(1, min(M, (24 * 2 ** 20) // max(per_sample, 1), 16))
    if M >= 2:
        tm = min(tm, M // 2)
    tm = max(tm, 1)
    while M % tm:
        tm -= 1
    return tm


def temporal_block(x, params, *, kernel_size, dilation, padding,
                   batch_tile=None, mxu_dtype=jnp.bfloat16):
    """x: (M, B, K) float32, PyTorch [batch, channels, time] layout."""
    M, B, K = x.shape
    H = params["w1"].shape[0]
    P = kernel_size
    # Non-causal "same" config only (output length == K).
    assert 2 * padding == dilation * (P - 1), "non-causal gLN config expected"

    TM = _pick_batch_tile(M, B, H, K, padding) if batch_tile is None else batch_tile
    assert M % TM == 0, "batch_tile must divide the batch size"
    G = M // TM
    N = TM * K

    # Packed per-channel params: [gamma1, beta1, gamma2, beta2, wd] -> (H, 4+P).
    cp = jnp.concatenate([params["gamma1"], params["beta1"],
                          params["gamma2"], params["beta2"],
                          params["wd"]], axis=1).astype(jnp.float32)

    # Per-tap validity masks over the concatenated (TM*K) time axis.
    k_in = jnp.arange(N, dtype=jnp.int32) % K
    tapmask = jnp.stack(
        [((k_in + (p * dilation - padding)) >= 0)
         & ((k_in + (p * dilation - padding)) < K) for p in range(P)],
        axis=0).astype(jnp.float32)                               # (P, N)

    # Lane-dense activation layout: (G, B, TM*K).
    xg = x.reshape(G, TM, B, K).transpose(0, 2, 1, 3).reshape(G, B, N)

    kernel = make_temporal_block_kernel(TM, K, B, H, P, dilation, padding, mxu_dtype)

    cost = pl.CostEstimate(
        flops=M * (4 * H * B * K + 2 * H * K * P + 24 * H * K),
        transcendentals=2 * M,
        bytes_accessed=4 * (2 * M * B * K + H * B + B * H + H * (4 + P) + P * N))

    vmem_est = 4 * (4 * B * N + 6 * H * N + H * (N + 2 * padding) + H * N
                    + H * B + B * H + H * (4 + P) + P * N)
    vmem_limit = int(min(max(2 * vmem_est, 16 * 2 ** 20), 64 * 2 ** 20))

    const2d = lambda g: (0, 0)
    out = pl.pallas_call(
        kernel,
        out_shape=jax.ShapeDtypeStruct((G, B, N), x.dtype),
        grid=(G,),
        in_specs=[
            pl.BlockSpec(memory_space=pltpu.MemorySpace.SMEM),    # alpha (2,)
            pl.BlockSpec((1, B, N), lambda g: (g, 0, 0)),         # x tile
            pl.BlockSpec((H, B), const2d),                        # w1 (conv1x1)
            pl.BlockSpec((B, H), const2d),                        # w2 (pointwise)
            pl.BlockSpec((H, 4 + P), const2d),                    # packed params
            pl.BlockSpec((P, N), const2d),                        # tap masks
        ],
        out_specs=pl.BlockSpec((1, B, N), lambda g: (g, 0, 0)),
        scratch_shapes=[pltpu.VMEM((H, N + 2 * padding), jnp.float32),
                        pltpu.VMEM((H, N), jnp.float32)],
        compiler_params=pltpu.CompilerParams(
            dimension_semantics=("parallel",),
            vmem_limit_bytes=vmem_limit),
        cost_estimate=cost,
    )(params["alpha"], xg, params["w1"], params["w2"], cp, tapmask)

    return out.reshape(G, B, TM, K).transpose(0, 2, 1, 3).reshape(M, B, K)


def ref_temporal_block(x, params, *, kernel_size, dilation, padding):
    """Pure-JAX reference in the same [M, C, K] layout, mirroring PyTorch."""
    M, B, K = x.shape
    a1, a2 = params["alpha"][0], params["alpha"][1]
    w1, w2, wd = params["w1"], params["w2"], params["wd"]

    y = jnp.einsum("hb,mbk->mhk", w1, x)
    y = jnp.where(y > 0, y, a1 * y)
    mean = jnp.mean(y, axis=(1, 2), keepdims=True)
    var = jnp.mean((y - mean) ** 2, axis=(1, 2), keepdims=True)
    y = params["gamma1"][None] * (y - mean) / jnp.sqrt(var + EPS) + params["beta1"][None]

    ypad = jnp.pad(y, ((0, 0), (0, 0), (padding, padding)))
    dw = jnp.zeros_like(y)
    for p in range(kernel_size):
        dw = dw + ypad[:, :, p * dilation: p * dilation + K] * wd[:, p][None, :, None]

    dw = jnp.where(dw > 0, dw, a2 * dw)
    mean2 = jnp.mean(dw, axis=(1, 2), keepdims=True)
    var2 = jnp.mean((dw - mean2) ** 2, axis=(1, 2), keepdims=True)
    dw = params["gamma2"][None] * (dw - mean2) / jnp.sqrt(var2 + EPS) + params["beta2"][None]

    return jnp.einsum("bh,mhk->mbk", w2, dw) + x


if __name__ == "__main__":
    # TemporalBlock config: in_channels B=8, hidden H=16, kernel_size=3,
    # stride=1, dilation=2, padding=(3-1)*2//2=2, norm='gLN', causal=False.
    M, B, H, K = 4, 8, 16, 32
    P, dilation = 3, 2
    padding = (P - 1) * dilation // 2

    key = jax.random.PRNGKey(0)
    k1, k2, k3, k4, k5, k6, k7, kx = jax.random.split(key, 8)
    params = {
        "alpha": jnp.array([0.25, 0.25], jnp.float32),                    # PReLU defaults
        "w1": jax.random.normal(k1, (H, B), jnp.float32) * 0.1,           # conv1x1 (B->H)
        "gamma1": 1.0 + 0.1 * jax.random.normal(k4, (H, 1), jnp.float32),
        "beta1": 0.1 * jax.random.normal(k5, (H, 1), jnp.float32),
        "wd": jax.random.normal(k2, (H, P), jnp.float32) * 0.1,           # depthwise (H, tap)
        "gamma2": 1.0 + 0.1 * jax.random.normal(k6, (H, 1), jnp.float32),
        "beta2": 0.1 * jax.random.normal(k7, (H, 1), jnp.float32),
        "w2": jax.random.normal(k3, (B, H), jnp.float32) * 0.1,           # pointwise (H->B)
    }
    x = jax.random.normal(kx, (M, B, K), jnp.float32)

    ref = jax.block_until_ready(
        ref_temporal_block(x, params, kernel_size=P, dilation=dilation, padding=padding))

    # Exact-semantics check: f32 MXU operands.
    out_f32 = jax.block_until_ready(
        temporal_block(x, params, kernel_size=P, dilation=dilation,
                       padding=padding, mxu_dtype=jnp.float32))
    assert out_f32.shape == (M, B, K)
    err_f32 = float(jnp.max(jnp.abs(out_f32 - ref)))
    assert jnp.allclose(out_f32, ref, rtol=1e-2, atol=1e-2), err_f32

    # Production config: bf16 MXU operands (looser tolerance from bf16 rounding).
    out_bf16 = jax.block_until_ready(
        temporal_block(x, params, kernel_size=P, dilation=dilation, padding=padding))
    err_bf16 = float(jnp.max(jnp.abs(out_bf16 - ref)))
    assert jnp.allclose(out_bf16, ref, rtol=5e-2, atol=5e-2), err_bf16

    print("KERNEL_OK")
</pallas_src>

<mosaic_0001>
module attributes {stable_mosaic.version = 11 : i64} {
  func.func @kernel(%arg0: i32, %arg1: memref<2xf32, #tpu.memory_space<smem>>, %arg2: memref<1x8x64xf32, #tpu.memory_space<vmem>>, %arg3: memref<16x8xf32, #tpu.memory_space<vmem>>, %arg4: memref<8x16xf32, #tpu.memory_space<vmem>>, %arg5: memref<16x7xf32, #tpu.memory_space<vmem>>, %arg6: memref<3x64xf32, #tpu.memory_space<vmem>>, %arg7: memref<1x8x64xf32, #tpu.memory_space<vmem>>, %arg8: memref<16x68xf32, #tpu.memory_space<vmem>>, %arg9: memref<16x64xf32, #tpu.memory_space<vmem>>) attributes {dimension_semantics = [#tpu.dimension_semantics<parallel>], iteration_bounds = array<i64: 2>, scalar_prefetch = 0 : i64, scratch_operands = 2 : i64, tpu.core_type = #tpu.core_type<tc>, window_params = [{transform_indices = @transform_0, window_bounds = array<i64: 2>}, {transform_indices = @transform_1, window_bounds = array<i64: 1, 8, 64>}, {pipeline_mode = #tpu.pipeline_mode<synchronous>, transform_indices = @transform_2, window_bounds = array<i64: 16, 8>}, {pipeline_mode = #tpu.pipeline_mode<synchronous>, transform_indices = @transform_3, window_bounds = array<i64: 8, 16>}, {pipeline_mode = #tpu.pipeline_mode<synchronous>, transform_indices = @transform_4, window_bounds = array<i64: 16, 7>}, {pipeline_mode = #tpu.pipeline_mode<synchronous>, transform_indices = @transform_5, window_bounds = array<i64: 3, 64>}, {transform_indices = @transform_6, window_bounds = array<i64: 1, 8, 64>}]} {
    %c0 = arith.constant 0 : index
    %0 = memref.load %arg1[%c0] : memref<2xf32, #tpu.memory_space<smem>>
    %c1 = arith.constant 1 : index
    %1 = memref.load %arg1[%c1] : memref<2xf32, #tpu.memory_space<smem>>
    %c0_0 = arith.constant 0 : index
    %c0_1 = arith.constant 0 : index
    %2 = vector.load %arg3[%c0_0, %c0_1] : memref<16x8xf32, #tpu.memory_space<vmem>>, vector<16x8xf32>
    %c0_2 = arith.constant 0 : index
    %c0_3 = arith.constant 0 : index
    %3 = vector.load %arg4[%c0_2, %c0_3] : memref<8x16xf32, #tpu.memory_space<vmem>>, vector<8x16xf32>
    %c0_4 = arith.constant 0 : index
    %c0_5 = arith.constant 0 : index
    %4 = vector.load %arg5[%c0_4, %c0_5] : memref<16x7xf32, #tpu.memory_space<vmem>>, vector<16x7xf32>
    %5 = vector.extract_strided_slice %4 {offsets = [0, 0], sizes = [16, 1], strides = [1, 1]} : vector<16x7xf32> to vector<16x1xf32>
    %6 = vector.extract_strided_slice %4 {offsets = [0, 1], sizes = [16, 1], strides = [1, 1]} : vector<16x7xf32> to vector<16x1xf32>
    %7 = vector.extract_strided_slice %4 {offsets = [0, 2], sizes = [16, 1], strides = [1, 1]} : vector<16x7xf32> to vector<16x1xf32>
    %8 = vector.extract_strided_slice %4 {offsets = [0, 3], sizes = [16, 1], strides = [1, 1]} : vector<16x7xf32> to vector<16x1xf32>
    %c0_6 = arith.constant 0 : index
    %c0_7 = arith.constant 0 : index
    %9 = vector.load %arg6[%c0_6, %c0_7] : memref<3x64xf32, #tpu.memory_space<vmem>>, vector<3x64xf32>
    %c0_8 = arith.constant 0 : index
    %c0_9 = arith.constant 0 : index
    %c0_10 = arith.constant 0 : index
    %10 = vector.load %arg2[%c0_8, %c0_9, %c0_10] : memref<1x8x64xf32, #tpu.memory_space<vmem>>, vector<1x8x64xf32>
    %11 = vector.shape_cast %10 : vector<1x8x64xf32> to vector<8x64xf32>
    %cst = arith.constant dense<0.000000e+00> : vector<16x64xf32>
    %12 = tpu.matmul %2, %11, %cst {dimension_numbers = #tpu.dot_dimension_numbers<[1], [0], [0], [1], [0, 0, 1, 1], [], []>} : vector<16x8xf32>, vector<8x64xf32>, vector<16x64xf32> -> vector<16x64xf32>
    %cst_11 = arith.constant 0.000000e+00 : f32
    %13 = vector.broadcast %cst_11 : f32 to vector<16x64xf32>
    %14 = arith.cmpf ogt, %12, %13 : vector<16x64xf32>
    %15 = vector.broadcast %0 : f32 to vector<16x64xf32>
    %16 = arith.mulf %15, %12 : vector<16x64xf32>
    %17 = arith.select %14, %12, %16 : vector<16x64xi1>, vector<16x64xf32>
    %cst_12 = arith.constant 0.000000e+00 : f32
    %18 = vector.broadcast %cst_12 : f32 to vector<16x2xf32>
    %c0_13 = arith.constant 0 : index
    %c0_14 = arith.constant 0 : index
    %19 = vector.load %arg8[%c0_13, %c0_14] : memref<16x68xf32, #tpu.memory_space<vmem>>, vector<16x2xf32>
    tpu.vector_store %arg8[%c0_13, %c0_14], %18 {strides = array<i32>} : memref<16x68xf32, #tpu.memory_space<vmem>>, vector<16x2xf32>,
    %c0_15 = arith.constant 0 : index
    %c66 = arith.constant 66 : index
    %20 = vector.load %arg8[%c0_15, %c66] : memref<16x68xf32, #tpu.memory_space<vmem>>, vector<16x2xf32>
    tpu.vector_store %arg8[%c0_15, %c66], %18 {strides = array<i32>} : memref<16x68xf32, #tpu.memory_space<vmem>>, vector<16x2xf32>,
    %21 = vector.extract_strided_slice %17 {offsets = [0, 0], sizes = [16, 32], strides = [1, 1]} : vector<16x64xf32> to vector<16x32xf32>
    %22 = vector.shape_cast %21 : vector<16x32xf32> to vector<1x16x32xf32>
    %cst_16 = arith.constant dense<0.000000e+00> : vector<1xf32>
    %23 = vector.multi_reduction <add>, %22, %cst_16 [1, 2] : vector<1x16x32xf32> to vector<1xf32>
    %24 = vector.shape_cast %23 : vector<1xf32> to vector<1x1x1xf32>
    %25 = vector.extract %24[0, 0, 0] : f32 from vector<1x1x1xf32>
    %26 = arith.mulf %21, %21 : vector<16x32xf32>
    %27 = vector.shape_cast %26 : vector<16x32xf32> to vector<1x16x32xf32>
    %cst_17 = arith.constant dense<0.000000e+00> : vector<1xf32>
    %28 = vector.multi_reduction <add>, %27, %cst_17 [1, 2] : vector<1x16x32xf32> to vector<1xf32>
    %29 = vector.shape_cast %28 : vector<1xf32> to vector<1x1x1xf32>
    %30 = vector.extract %29[0, 0, 0] : f32 from vector<1x1x1xf32>
    %cst_18 = arith.constant 0.001953125 : f32
    %31 = arith.mulf %25, %cst_18 : f32
    %cst_19 = arith.constant 0.001953125 : f32
    %32 = arith.mulf %30, %cst_19 : f32
    %33 = arith.mulf %31, %31 : f32
    %34 = arith.subf %32, %33 : f32
    %cst_20 = arith.constant 0.000000e+00 : f32
    %35 = arith.maximumf %34, %cst_20 : f32
    %cst_21 = arith.constant 9.99999993E-9 : f32
    %36 = arith.addf %35, %cst_21 : f32
    %37 = math.rsqrt %36 : f32
    %38 = vector.broadcast %37 : f32 to vector<16x1xf32>
    %39 = arith.mulf %5, %38 : vector<16x1xf32>
    %40 = vector.broadcast %31 : f32 to vector<16x1xf32>
    %41 = arith.mulf %40, %39 : vector<16x1xf32>
    %42 = arith.subf %6, %41 : vector<16x1xf32>
    %43 = vector.broadcast %39 : vector<16x1xf32> to vector<16x32xf32>
    %44 = arith.mulf %21, %43 : vector<16x32xf32>
    %45 = vector.broadcast %42 : vector<16x1xf32> to vector<16x32xf32>
    %46 = arith.addf %44, %45 : vector<16x32xf32>
    %c0_22 = arith.constant 0 : index
    %c2 = arith.constant 2 : index
    %47 = vector.load %arg8[%c0_22, %c2] : memref<16x68xf32, #tpu.memory_space<vmem>>, vector<16x32xf32>
    tpu.vector_store %arg8[%c0_22, %c2], %46 {strides = array<i32>} : memref<16x68xf32, #tpu.memory_space<vmem>>, vector<16x32xf32>,
    %48 = vector.extract_strided_slice %17 {offsets = [0, 32], sizes = [16, 32], strides = [1, 1]} : vector<16x64xf32> to vector<16x32xf32>
    %49 = vector.shape_cast %48 : vector<16x32xf32> to vector<1x16x32xf32>
    %cst_23 = arith.constant dense<0.000000e+00> : vector<1xf32>
    %50 = vector.multi_reduction <add>, %49, %cst_23 [1, 2] : vector<1x16x32xf32> to vector<1xf32>
    %51 = vector.shape_cast %50 : vector<1xf32> to vector<1x1x1xf32>
    %52 = vector.extract %51[0, 0, 0] : f32 from vector<1x1x1xf32>
    %53 = arith.mulf %48, %48 : vector<16x32xf32>
    %54 = vector.shape_cast %53 : vector<16x32xf32> to vector<1x16x32xf32>
    %cst_24 = arith.constant dense<0.000000e+00> : vector<1xf32>
    %55 = vector.multi_reduction <add>, %54, %cst_24 [1, 2] : vector<1x16x32xf32> to vector<1xf32>
    %56 = vector.shape_cast %55 : vector<1xf32> to vector<1x1x1xf32>
    %57 = vector.extract %56[0, 0, 0] : f32 from vector<1x1x1xf32>
    %cst_25 = arith.constant 0.001953125 : f32
    %58 = arith.mulf %52, %cst_25 : f32
    %cst_26 = arith.constant 0.001953125 : f32
    %59 = arith.mulf %57, %cst_26 : f32
    %60 = arith.mulf %58, %58 : f32
    %61 = arith.subf %59, %60 : f32
    %cst_27 = arith.constant 0.000000e+00 : f32
    %62 = arith.maximumf %61, %cst_27 : f32
    %cst_28 = arith.constant 9.99999993E-9 : f32
    %63 = arith.addf %62, %cst_28 : f32
    %64 = math.rsqrt %63 : f32
    %65 = vector.broadcast %64 : f32 to vector<16x1xf32>
    %66 = arith.mulf %5, %65 : vector<16x1xf32>
    %67 = vector.broadcast %58 : f32 to vector<16x1xf32>
    %68 = arith.mulf %67, %66 : vector<16x1xf32>
    %69 = arith.subf %6, %68 : vector<16x1xf32>
    %70 = vector.broadcast %66 : vector<16x1xf32> to vector<16x32xf32>
    %71 = arith.mulf %48, %70 : vector<16x32xf32>
    %72 = vector.broadcast %69 : vector<16x1xf32> to vector<16x32xf32>
    %73 = arith.addf %71, %72 : vector<16x32xf32>
    %c0_29 = arith.constant 0 : index
    %c34 = arith.constant 34 : index
    %74 = vector.load %arg8[%c0_29, %c34] : memref<16x68xf32, #tpu.memory_space<vmem>>, vector<16x32xf32>
    tpu.vector_store %arg8[%c0_29, %c34], %73 {strides = array<i32>} : memref<16x68xf32, #tpu.memory_space<vmem>>, vector<16x32xf32>,
    %c0_30 = arith.constant 0 : index
    %c0_31 = arith.constant 0 : index
    %75 = vector.load %arg8[%c0_30, %c0_31] : memref<16x68xf32, #tpu.memory_space<vmem>>, vector<16x64xf32>
    %76 = vector.extract_strided_slice %4 {offsets = [0, 4], sizes = [16, 1], strides = [1, 1]} : vector<16x7xf32> to vector<16x1xf32>
    %77 = vector.broadcast %76 : vector<16x1xf32> to vector<16x64xf32>
    %78 = arith.mulf %75, %77 : vector<16x64xf32>
    %79 = vector.extract_strided_slice %9 {offsets = [0, 0], sizes = [1, 64], strides = [1, 1]} : vector<3x64xf32> to vector<1x64xf32>
    %80 = vector.broadcast %79 : vector<1x64xf32> to vector<16x64xf32>
    %81 = arith.mulf %78, %80 : vector<16x64xf32>
    %c0_32 = arith.constant 0 : index
    %c2_33 = arith.constant 2 : index
    %82 = vector.load %arg8[%c0_32, %c2_33] : memref<16x68xf32, #tpu.memory_space<vmem>>, vector<16x64xf32>
    %83 = vector.extract_strided_slice %4 {offsets = [0, 5], sizes = [16, 1], strides = [1, 1]} : vector<16x7xf32> to vector<16x1xf32>
    %84 = vector.broadcast %83 : vector<16x1xf32> to vector<16x64xf32>
    %85 = arith.mulf %82, %84 : vector<16x64xf32>
    %86 = arith.addf %81, %85 : vector<16x64xf32>
    %c0_34 = arith.constant 0 : index
    %c4 = arith.constant 4 : index
    %87 = vector.load %arg8[%c0_34, %c4] : memref<16x68xf32, #tpu.memory_space<vmem>>, vector<16x64xf32>
    %88 = vector.extract_strided_slice %4 {offsets = [0, 6], sizes = [16, 1], strides = [1, 1]} : vector<16x7xf32> to vector<16x1xf32>
    %89 = vector.broadcast %88 : vector<16x1xf32> to vector<16x64xf32>
    %90 = arith.mulf %87, %89 : vector<16x64xf32>
    %91 = vector.extract_strided_slice %9 {offsets = [2, 0], sizes = [1, 64], strides = [1, 1]} : vector<3x64xf32> to vector<1x64xf32>
    %92 = vector.broadcast %91 : vector<1x64xf32> to vector<16x64xf32>
    %93 = arith.mulf %90, %92 : vector<16x64xf32>
    %94 = arith.addf %86, %93 : vector<16x64xf32>
    %cst_35 = arith.constant 0.000000e+00 : f32
    %95 = vector.broadcast %cst_35 : f32 to vector<16x64xf32>
    %96 = arith.cmpf ogt, %94, %95 : vector<16x64xf32>
    %97 = vector.broadcast %1 : f32 to vector<16x64xf32>
    %98 = arith.mulf %97, %94 : vector<16x64xf32>
    %99 = arith.select %96, %94, %98 : vector<16x64xi1>, vector<16x64xf32>
    %100 = vector.extract_strided_slice %99 {offsets = [0, 0], sizes = [16, 32], strides = [1, 1]} : vector<16x64xf32> to vector<16x32xf32>
    %101 = vector.shape_cast %100 : vector<16x32xf32> to vector<1x16x32xf32>
    %cst_36 = arith.constant dense<0.000000e+00> : vector<1xf32>
    %102 = vector.multi_reduction <add>, %101, %cst_36 [1, 2] : vector<1x16x32xf32> to vector<1xf32>
    %103 = vector.shape_cast %102 : vector<1xf32> to vector<1x1x1xf32>
    %104 = vector.extract %103[0, 0, 0] : f32 from vector<1x1x1xf32>
    %105 = arith.mulf %100, %100 : vector<16x32xf32>
    %106 = vector.shape_cast %105 : vector<16x32xf32> to vector<1x16x32xf32>
    %cst_37 = arith.constant dense<0.000000e+00> : vector<1xf32>
    %107 = vector.multi_reduction <add>, %106, %cst_37 [1, 2] : vector<1x16x32xf32> to vector<1xf32>
    %108 = vector.shape_cast %107 : vector<1xf32> to vector<1x1x1xf32>
    %109 = vector.extract %108[0, 0, 0] : f32 from vector<1x1x1xf32>
    %cst_38 = arith.constant 0.001953125 : f32
    %110 = arith.mulf %104, %cst_38 : f32
    %cst_39 = arith.constant 0.001953125 : f32
    %111 = arith.mulf %109, %cst_39 : f32
    %112 = arith.mulf %110, %110 : f32
    %113 = arith.subf %111, %112 : f32
    %cst_40 = arith.constant 0.000000e+00 : f32
    %114 = arith.maximumf %113, %cst_40 : f32
    %cst_41 = arith.constant 9.99999993E-9 : f32
    %115 = arith.addf %114, %cst_41 : f32
    %116 = math.rsqrt %115 : f32
    %117 = vector.broadcast %116 : f32 to vector<16x1xf32>
    %118 = arith.mulf %7, %117 : vector<16x1xf32>
    %119 = vector.broadcast %110 : f32 to vector<16x1xf32>
    %120 = arith.mulf %119, %118 : vector<16x1xf32>
    %121 = arith.subf %8, %120 : vector<16x1xf32>
    %122 = vector.broadcast %118 : vector<16x1xf32> to vector<16x32xf32>
    %123 = arith.mulf %100, %122 : vector<16x32xf32>
    %124 = vector.broadcast %121 : vector<16x1xf32> to vector<16x32xf32>
    %125 = arith.addf %123, %124 : vector<16x32xf32>
    %c0_42 = arith.constant 0 : index
    %c0_43 = arith.constant 0 : index
    %126 = vector.load %arg9[%c0_42, %c0_43] : memref<16x64xf32, #tpu.memory_space<vmem>>, vector<16x32xf32>
    tpu.vector_store %arg9[%c0_42, %c0_43], %125 {strides = array<i32>} : memref<16x64xf32, #tpu.memory_space<vmem>>, vector<16x32xf32>,
    %127 = vector.extract_strided_slice %99 {offsets = [0, 32], sizes = [16, 32], strides = [1, 1]} : vector<16x64xf32> to vector<16x32xf32>
    %128 = vector.shape_cast %127 : vector<16x32xf32> to vector<1x16x32xf32>
    %cst_44 = arith.constant dense<0.000000e+00> : vector<1xf32>
    %129 = vector.multi_reduction <add>, %128, %cst_44 [1, 2] : vector<1x16x32xf32> to vector<1xf32>
    %130 = vector.shape_cast %129 : vector<1xf32> to vector<1x1x1xf32>
    %131 = vector.extract %130[0, 0, 0] : f32 from vector<1x1x1xf32>
    %132 = arith.mulf %127, %127 : vector<16x32xf32>
    %133 = vector.shape_cast %132 : vector<16x32xf32> to vector<1x16x32xf32>
    %cst_45 = arith.constant dense<0.000000e+00> : vector<1xf32>
    %134 = vector.multi_reduction <add>, %133, %cst_45 [1, 2] : vector<1x16x32xf32> to vector<1xf32>
    %135 = vector.shape_cast %134 : vector<1xf32> to vector<1x1x1xf32>
    %136 = vector.extract %135[0, 0, 0] : f32 from vector<1x1x1xf32>
    %cst_46 = arith.constant 0.001953125 : f32
    %137 = arith.mulf %131, %cst_46 : f32
    %cst_47 = arith.constant 0.001953125 : f32
    %138 = arith.mulf %136, %cst_47 : f32
    %139 = arith.mulf %137, %137 : f32
    %140 = arith.subf %138, %139 : f32
    %cst_48 = arith.constant 0.000000e+00 : f32
    %141 = arith.maximumf %140, %cst_48 : f32
    %cst_49 = arith.constant 9.99999993E-9 : f32
    %142 = arith.addf %141, %cst_49 : f32
    %143 = math.rsqrt %142 : f32
    %144 = vector.broadcast %143 : f32 to vector<16x1xf32>
    %145 = arith.mulf %7, %144 : vector<16x1xf32>
    %146 = vector.broadcast %137 : f32 to vector<16x1xf32>
    %147 = arith.mulf %146, %145 : vector<16x1xf32>
    %148 = arith.subf %8, %147 : vector<16x1xf32>
    %149 = vector.broadcast %145 : vector<16x1xf32> to vector<16x32xf32>
    %150 = arith.mulf %127, %149 : vector<16x32xf32>
    %151 = vector.broadcast %148 : vector<16x1xf32> to vector<16x32xf32>
    %152 = arith.addf %150, %151 : vector<16x32xf32>
    %c0_50 = arith.constant 0 : index
    %c32 = arith.constant 32 : index
    %153 = vector.load %arg9[%c0_50, %c32] : memref<16x64xf32, #tpu.memory_space<vmem>>, vector<16x32xf32>
    tpu.vector_store %arg9[%c0_50, %c32], %152 {strides = array<i32>} : memref<16x64xf32, #tpu.memory_space<vmem>>, vector<16x32xf32>,
    %c0_51 = arith.constant 0 : index
    %c0_52 = arith.constant 0 : index
    %154 = vector.load %arg9[%c0_51, %c0_52] : memref<16x64xf32, #tpu.memory_space<vmem>>, vector<16x64xf32>
    %cst_53 = arith.constant dense<0.000000e+00> : vector<8x64xf32>
    %155 = tpu.matmul %3, %154, %cst_53 {dimension_numbers = #tpu.dot_dimension_numbers<[1], [0], [0], [1], [0, 0, 1, 1], [], []>} : vector<8x16xf32>, vector<16x64xf32>, vector<8x64xf32> -> vector<8x64xf32>
    %156 = arith.addf %155, %11 : vector<8x64xf32>
    %c0_54 = arith.constant 0 : index
    %c0_55 = arith.constant 0 : index
    %c0_56 = arith.constant 0 : index
    %157 = vector.load %arg7[%c0_54, %c0_55, %c0_56] : memref<1x8x64xf32, #tpu.memory_space<vmem>>, vector<1x8x64xf32>
    %158 = vector.shape_cast %157 : vector<1x8x64xf32> to vector<8x64xf32>
    %159 = vector.shape_cast %156 : vector<8x64xf32> to vector<1x8x64xf32>
    tpu.vector_store %arg7[%c0_54, %c0_55, %c0_56], %159 {strides = array<i32>} : memref<1x8x64xf32, #tpu.memory_space<vmem>>, vector<1x8x64xf32>,
    return
  }
  func.func @transform_0(%arg0: i32) -> i32 {
    %c0_i32 = arith.constant 0 : i32
    %c0_i32_0 = arith.constant 0 : i32
    return %c0_i32 : i32
  }
  func.func @transform_1(%arg0: i32) -> (i32, i32, i32) {
    %c0_i32 = arith.constant 0 : i32
    %c0_i32_0 = arith.constant 0 : i32
    %c0_i32_1 = arith.constant 0 : i32
    return %arg0, %c0_i32, %c0_i32_0 : i32, i32, i32
  }
  func.func @transform_2(%arg0: i32) -> (i32, i32) {
    %c0_i32 = arith.constant 0 : i32
    %c0_i32_0 = arith.constant 0 : i32
    %c0_i32_1 = arith.constant 0 : i32
    return %c0_i32, %c0_i32_0 : i32, i32
  }
  func.func @transform_3(%arg0: i32) -> (i32, i32) {
    %c0_i32 = arith.constant 0 : i32
    %c0_i32_0 = arith.constant 0 : i32
    %c0_i32_1 = arith.constant 0 : i32
    return %c0_i32, %c0_i32_0 : i32, i32
  }
  func.func @transform_4(%arg0: i32) -> (i32, i32) {
    %c0_i32 = arith.constant 0 : i32
    %c0_i32_0 = arith.constant 0 : i32
    %c0_i32_1 = arith.constant 0 : i32
    return %c0_i32, %c0_i32_0 : i32, i32
  }
  func.func @transform_5(%arg0: i32) -> (i32, i32) {
    %c0_i32 = arith.constant 0 : i32
    %c0_i32_0 = arith.constant 0 : i32
    %c0_i32_1 = arith.constant 0 : i32
    return %c0_i32, %c0_i32_0 : i32, i32
  }
  func.func @transform_6(%arg0: i32) -> (i32, i32, i32) {
    %c0_i32 = arith.constant 0 : i32
    %c0_i32_0 = arith.constant 0 : i32
    %c0_i32_1 = arith.constant 0 : i32
    return %arg0, %c0_i32, %c0_i32_0 : i32, i32, i32
  }
}

</mosaic_0001>

<bundles_post_ra>
// kernel: tpu_custom_call.1
= control target key start
LH: loop header
LB: loop body
LE: loop exit
PB: predicated region body
PF: predicated region fallthrough
CT: control target
= control target key end

     0   :  { %11 = vsyncpa [#allocation6], 0  ;;  %s1388_s0 = inlined_call_operand.vmem [shape: f32[2], index: 0, kind: input, shape index: {}]   ;;  %s1389_s1 = inlined_call_operand.vmem [shape: f32[2,8,64], index: 1, kind: input, shape index: {}]   ;;  %s1390_s2 = inlined_call_operand.vmem [shape: f32[16,8], index: 2, kind: input, shape index: {}]   ;;  %s1391_s3 = inlined_call_operand.vmem [shape: f32[8,16], index: 3, kind: input, shape index: {}]   ;;  %s1392_s4 = inlined_call_operand.vmem [shape: f32[16,7], index: 4, kind: input, shape index: {}]   ;;  %s1393_s5 = inlined_call_operand.vmem [shape: f32[3,64], index: 5, kind: input, shape index: {}]   ;;  %s1394_s6 = inlined_call_operand.hbm [shape: f32[2,8,64], index: 6, kind: output, shape index: {}]  }
   0x1   :  { %12 = vsyncpa [#allocation5], 0 }
   0x2   :  { %14 = vsyncpa [#allocation5 + $0x1], 0  ;;  %s1156_s21 = smov 0   ;;  %s1158_s22 = smov 0  }
   0x3   :  { %s1160_s23 = smov 0   ;;  %s1162_s24 = smov 0  }
   0x4 LB: > { %s1177_s25 = sadd.s32 4294967295, %s1103_s24   ;;  %s891_s26 = sadd.s32 4294967294, %s1103_s24   ;;  %s1103_s24 = sphi %s1162_s24, %s1400_s24   ;;  %s1099_s23 = sphi %s1160_s23, %s1399_s23   ;;  %s1095_s22 = sphi %s1158_s22, %s1398_s22   ;;  %s1091_s21 = sphi %s1156_s21, %s1397_s21  }
   0x5   : > { %s1181_s27 = sadd.s32 1, %s1103_s24   ;;  %s158_s28 = sadd.s32 1, %s1099_s23 }
   0x6   : > { %s155_s29 = ssub.s32 %s1103_s24, %s1181_s27  ;;  %p168_p0 = scmp.ne.s32.totalorder %s1099_s23, %s1095_s22 }
   0x7   : > { %p156_p1 = scmp.eq.s32.totalorder %s155_s29, 0  ;;  %p169_p2 = scmp.eq.s32.totalorder %s1177_s25, 1 }
   0x8   : > { %p174_p3 = scmp.ne.s32.totalorder %s1095_s22, %s1091_s21  ;;  %p175_p4 = scmp.eq.s32.totalorder %s891_s26, 1 }
   0x9   : > { %s1192_s30 = scalar_select %p156_p1, %s1099_s23, %s158_s28  }
   0xa   : > { %p1194_p5 = por %p169_p2, %p168_p0  ;;  %p1198_p6 = por %p175_p4, %p174_p3 }
   0xb   : > { %p892_p7 = scmp.ge.s32.totalorder %s1103_s24, 1  ;;  %p182_p8 = scmp.lt.s32.totalorder %s1103_s24, 3 }
   0xc   : > { %p946_p9 = scmp.eq.s32.totalorder %s1177_s25, 0  ;;  %s194_s11 = sshll.u32 %s1388_s0, 4  ;;  %s195_s11 = int_to_ptr.vmem [resolvable:$true] %s194_s11 }
   0xd   : > { %p183_p10 = pnand %p892_p7, %p182_p8  ;;  %s1105_s12 = smov [#allocation4]  }
   0xf   : > { %p938_p11 = pneg %p183_p10  ;;  %226 = sbr.rel (%p183_p10) target bundleno = 1747 (0x6d3), region = 44 }
  0x11   : > { %p939_p12 = pnand %p946_p9, %p938_p11 }
  0x13   : > { %941 = dma.vmem_to_smem (!%p939_p12), %s195_s11, 16, %s1105_s12, [#allocation6]  }
  0x14   : > { %1082 = dma.done.wait (%p946_p9), [#allocation6], 16  }
  0x15   : > { %1084 = vsyncadd (%p946_p9), [#allocation6], 4294967280 }
  0x16   : > { %233 = sfence }
  0x17   : > { %p257_p13 = scmp.lt.s32.totalorder %s1177_s25, 1  ;;  %v263_v0 = vld [vmem:[%s1390_s2] sm:$0xff]  ;;  %vm270_vm0 = vcmask 64512   ;;  %v264_v1 = vld [vmem:[%s1390_s2 + $0x8] sm:$0xff]  ;;  %s261_s28 = sld [smem:[#allocation4]]  ;;  %vm313_vm3 = vcmask 261120  }
  0x18   : > { %s1106_s29 = smov 96   ;;  %s1107_s15 = smov 0.0   ;;  %v1108_v58 = vmov 0   ;;  %vm307_vm10 = vcmask 15360   ;;  %vm310_vm11 = vcmask 556560   ;;  %vm406_vm12 = vcmask 277520  }
  0x19   : > { %s258_s13 = scalar_select %p257_p13, %s1177_s25, 1  ;;  %998 = vset.pattern.permute.xlu0 %v1108_v58  ;;  %997 = vset.pattern.permute.xlu2 %v1108_v58  ;;  %vm515_vm13 = vcmask 539920  }
  0x1a   : > { %s1111_s20 = smov 2  }
  0x1b   : > { %s898_s14 = sshll.u32 %s258_s13, 3 }
  0x1c   : > { %s260_s17 = scalar_lea.vmem %s1389_s1, %s898_s14 }
  0x1d   : > { %v1219_v2 = vld [vmem:[%s260_s17] sm:$0xff]  ;;  %v302_v3 = vstv %s261_s28 }
  0x1e   : > { %292 = vmatpush.msra.mxu0 %v1219_v2  ;;  %907 = vmatpush.msra.mxu2 %v1219_v2 }
  0x1f   : > { %900 = vmatmul.msk.f32.vlgmr.msra.gmra.mxu0 %vm270_vm0, %v263_v0  ;;  %901 = vmatmul.msk.f32.vlgmr.msra.gmra.mxu2 %vm270_vm0, %v264_v1  ;;  %v1255_v1 = vld [vmem:[%s1392_s4] sm:$0xff] }
  0x9c   : > { %v294_v4 = vpop.f32.mrf.mxu0 }
  0x9d   : > { %vm300_vm1 = vcmp.gt.f32.partialorder %v294_v4, 0.0  ;;  %v303_v5 = vmul.f32 %v302_v3, %v294_v4 }
  0x9f   : > { %v1223_v6 = vsel %vm300_vm1, %v294_v4, %v303_v5 }
  0xa0   : > { %411 = vrot.lane.b32.xlu1 %v1223_v6, %s1106_s29  ;;  %v326_v7 = vmul.f32 %v1223_v6, %v1223_v6  ;;  %v314_v11 = vsel %vm313_vm3, %v1223_v6, 0.0 }
  0xa2   : > { %v297_v8 = vpop.f32.mrf.mxu2  ;;  %431 = vrot.lane.b32.xlu2 %v326_v7, %s1106_s29  ;;  %v328_v16 = vsel %vm313_vm3, %v326_v7, 0.0 }
  0xa3   : > { %vm301_vm2 = vcmp.gt.f32.partialorder %v297_v8, 0.0  ;;  %v304_v9 = vmul.f32 %v302_v3, %v297_v8  ;;  %v1260_v3 = vld [vmem:[%s1392_s4 + $0x8] sm:$0xff] }
  0xa5   : > { %v1230_v10 = vsel %vm301_vm2, %v297_v8, %v304_v9 }
  0xa6   : > { %v315_v12 = vsel %vm313_vm3, %v1230_v10, 0.0  ;;  %v327_v14 = vmul.f32 %v1230_v10, %v1230_v10 }
  0xa7   : > { %v316_v13 = vadd.f32 %v315_v12, %v314_v11 }
  0xa8   : > { %413 = vrot.lane.b32.xlu1 %v1230_v10, %s1106_s29  ;;  %v329_v15 = vsel %vm313_vm3, %v327_v14, 0.0 }
  0xa9   : > { %317 = vadd.xlane.f32.xlu0 %v316_v13  ;;  %v330_v17 = vadd.f32 %v329_v15, %v328_v16 }
  0xaa   : > { %433 = vrot.lane.b32.xlu2 %v327_v14, %s1106_s29 }
  0xb1   : > { %331 = vadd.xlane.f32.xlu0 %v330_v17 }
  0xfc   : > { %v432_v18 = vpop.permute.xlu2 %431 }
  0xfd   : > { %v437_v20 = vsel %vm313_vm3, %v432_v18, 0.0 }
 0x104   : > { %v434_v19 = vpop.permute.xlu2 %433 }
 0x105   : > { %v438_v21 = vsel %vm313_vm3, %v434_v19, 0.0 }
 0x106   : > { %v439_v22 = vadd.f32 %v438_v21, %v437_v20  ;;  %v1110_v20 = vmov 1  }
 0x107   : > { %999 = vset.pattern.permute.xlu1 %v1110_v20 }
 0x108   : > { %440 = vadd.xlane.f32.xlu1 %v439_v22 }
 0x112   : > { %v412_v23 = vpop.permute.xlu1 %411 }
 0x113   : > { %v417_v25 = vsel %vm313_vm3, %v412_v23, 0.0 }
 0x11a   : > { %v414_v24 = vpop.permute.xlu1 %413 }
 0x11b   : > { %v418_v26 = vsel %vm313_vm3, %v414_v24, 0.0 }
 0x11c   : > { %v318_v27 = vpop.xlane.xlu0 %317  ;;  %v419_v28 = vadd.f32 %v418_v26, %v417_v25 }
 0x11d   : > { %v319_v29 = vrot.slane %v318_v27, 4 }
 0x11e   : > { %420 = vadd.xlane.f32.xlu0 %v419_v28 }
 0x11f   : > { %v320_v30 = vadd.f32 %v319_v29, %v318_v27 }
 0x121   : > { %v321_v31 = vrot.slane %v320_v30, 2 }
 0x123   : > { %v322_v32 = vadd.f32 %v321_v31, %v320_v30 }
 0x124   : > { %v332_v33 = vpop.xlane.xlu0 %331 }
 0x125   : > { %v333_v34 = vrot.slane %v332_v33, 4  ;;  %v323_v35 = vrot.slane %v322_v32, 1 }
 0x127   : > { %v334_v36 = vadd.f32 %v333_v34, %v332_v33  ;;  %v324_v37 = vadd.f32 %v323_v35, %v322_v32 }
 0x129   : > { %v335_v38 = vrot.slane %v334_v36, 2  ;;  %908 = vpush %v324_v37 }
 0x12b   : > { %v336_v39 = vadd.f32 %v335_v38, %v334_v36 }
 0x12d   : > { %v337_v40 = vrot.slane %v336_v39, 1 }
 0x12f   : > { %v338_v41 = vadd.f32 %v337_v40, %v336_v39 }
 0x131   : > { %910 = vpush %v338_v41 }
 0x15a   : > { %s909_s9 = spop %908 }
 0x15b   : > { %s1247_s10 = smul.f32 0.001953125, %s909_s9  ;;  %s1109_s9 = smov 1  }
 0x15d   : > { %s342_s11 = smul.f32 %s1247_s10, %s1247_s10  ;;  %v361_v8 = vstv %s1247_s10 }
 0x162   : > { %s911_s12 = spop %910 }
 0x163   : > { %s341_s13 = smul.f32 0.001953125, %s911_s12 }
 0x165   : > { %s343_s14 = ssub.f32 %s341_s13, %s342_s11 }
 0x167   : > { %s344_s16 = smax.f32 %s1107_s15, %s343_s14 }
 0x168   : > { %s345_s17 = sadd.f32 1e-08, %s344_s16 }
 0x16a   : > { %v346_v42 = vstv %s345_s17 }
 0x16b   : > { %1014 = vrsqrt.f32 %v346_v42  ;;  %vm353_vm5 = vweird.f32 %v346_v42 }
 0x171   : > { %v1015_v43 = vpop.eup %1014 }
 0x172   : > { %v348_v44 = vmul.f32 %v1015_v43, %v346_v42  ;;  %vm354_vm4 = vweird.f32 %v1015_v43 }
 0x173   : > { %vm355_vm6 = vmor %vm353_vm5, %vm354_vm4 }
 0x174   : > { %v349_v45 = vmul.f32 %v1015_v43, %v348_v44  ;;  %v1113_v44 = vmov 6  }
 0x176   : > { %v350_v46 = vmul.f32 0.5, %v349_v45 }
 0x178   : > { %v351_v47 = vsub.f32 1.5, %v350_v46 }
 0x17a   : > { %v352_v48 = vmul.f32 %v1015_v43, %v351_v47  ;;  %v1114_v47 = vmov 0.0  }
 0x17b   : > { %v441_v50 = vpop.xlane.xlu1 %440  ;;  %309 = vst.msk [vmem:[#allocation2 + $0x8] sm:$0xff] %vm307_vm10, %v1114_v47 }
 0x17c   : > { %v356_v49 = vsel %vm355_vm6, %v1015_v43, %v352_v48  ;;  %v442_v51 = vrot.slane %v441_v50, 4  ;;  %v1112_v43 = vmov 5   ;;  %v1115_v48 = vmov 4   ;;  %312 = vst.msk [vmem:[#allocation2 + $0x8] sm:$0xff] %vm310_vm11, %v1114_v47 }
 0x17d   : > { %912 = vpush %v356_v49 }
 0x17e   : > { %v443_v52 = vadd.f32 %v442_v51, %v441_v50  ;;  %308 = vst.msk [vmem:[#allocation2] sm:$0xff] %vm307_vm10, %v1114_v47 }
 0x17f   : > { %311 = vst.msk [vmem:[#allocation2] sm:$0xff] %vm310_vm11, %v1114_v47 }
 0x180   : > { %v444_v53 = vrot.slane %v443_v52, 2 }
 0x182   : > { %v445_v57 = vadd.f32 %v444_v53, %v443_v52 }
 0x184   : > { %v446_v61 = vrot.slane %v445_v57, 1 }
 0x186   : > { %v447_v0 = vadd.f32 %v446_v61, %v445_v57 }
 0x191   : > { %v421_v54 = vpop.xlane.xlu0 %420 }
 0x192   : > { %v422_v55 = vrot.slane %v421_v54, 4 }
 0x194   : > { %v423_v56 = vadd.f32 %v422_v55, %v421_v54  ;;  %v268_v55 = vld [vmem:[%s1393_s5] sm:$0x7] }
 0x196   : > { %v424_v59 = vrot.slane %v423_v56, 2 }
 0x198   : > { %v425_v60 = vadd.f32 %v424_v59, %v423_v56  ;;  %v565_v56 = vperm.slane %v268_v55, 2 }
 0x19a   : > { %v426_v62 = vrot.slane %v425_v60, 1 }
 0x19c   : > { %v427_v63 = vadd.f32 %v426_v62, %v425_v60 }
 0x19e   : > { %914 = vpush %v427_v63 }
 0x19f   : > { %916 = vpush %v447_v0 }
 0x1ae   : > { %s913_s28 = spop %912 }
 0x1af   : > { %v358_v4 = vstv %s913_s28 }
 0x1b0   : > { %v359_v5 = vmul.f32 %v358_v4, %v1255_v1  ;;  %v360_v7 = vmul.f32 %v358_v4, %v1260_v3 }
 0x1b2   : > { %v362_v9 = vmul.f32 %v361_v8, %v359_v5  ;;  %v363_v11 = vmul.f32 %v361_v8, %v360_v7 }
 0x1b4   : > { %368 = vrot.lane.b32.xlu0 %v363_v11, %s1109_s9  ;;  %366 = vrot.lane.b32.xlu2 %v362_v9, %s1109_s9 }
 0x1bc   : > { %381 = vperm.xlu0 %998, %v360_v7  }
 0x1c4   : > { %1000 = vset.pattern.permute.xlu0 %v1110_v20 }
 0x1cf   : > { %s915_s11 = spop %914 }
 0x1d0   : > { %s1267_s12 = smul.f32 0.001953125, %s915_s11  ;;  %s917_s13 = spop %916 }
 0x1d1   : > { %s450_s14 = smul.f32 0.001953125, %s917_s13  ;;  %s1116_s11 = smov 4  }
 0x1d2   : > { %s451_s16 = smul.f32 %s1267_s12, %s1267_s12  ;;  %v470_v25 = vstv %s1267_s12  ;;  %s1117_s12 = smov 126  }
 0x1d3   : > { %s1118_s13 = smov 124  }
 0x1d4   : > { %s452_s17 = ssub.f32 %s450_s14, %s451_s16 }
 0x1d5   : > { %s899_s14 = sld [smem:[#allocation4 + $0x1]] }
 0x1d6   : > { %s453_s18 = smax.f32 %s1107_s15, %s452_s17 }
 0x1d7   : > { %s454_s10 = sadd.f32 1e-08, %s453_s18 }
 0x1d9   : > { %v455_v12 = vstv %s454_s10 }
 0x1da   : > { %1016 = vrsqrt.f32 %v455_v12  ;;  %vm462_vm8 = vweird.f32 %v455_v12 }
 0x1e0   : > { %v1017_v13 = vpop.eup %1016 }
 0x1e1   : > { %v457_v14 = vmul.f32 %v1017_v13, %v455_v12  ;;  %vm463_vm7 = vweird.f32 %v1017_v13 }
 0x1e2   : > { %vm464_vm9 = vmor %vm462_vm8, %vm463_vm7  ;;  %vm773_vm7 = vcmask 523520   ;;  %vm802_vm8 = vcmask 523264  }
 0x1e3   : > { %v458_v15 = vmul.f32 %v1017_v13, %v457_v14 }
 0x1e5   : > { %v459_v16 = vmul.f32 0.5, %v458_v15 }
 0x1e7   : > { %v460_v17 = vsub.f32 1.5, %v459_v16 }
 0x1e9   : > { %v461_v18 = vmul.f32 %v1017_v13, %v460_v17 }
 0x1eb   : > { %v465_v19 = vsel %vm464_vm9, %v1017_v13, %v461_v18  ;;  %v532_v18 = vperm.slane %v268_v55, 0 }
 0x1ec   : > { %918 = vpush %v465_v19 }
 0x20e   : > { %v367_v21 = vpop.permute.xlu2 %366 }
 0x20f   : > { %v372_v22 = vsub.f32 %v1255_v1, %v367_v21 }
 0x211   : > { %388 = vperm.xlu1 %999, %v372_v22  }
 0x219   : > { %1003 = vset.pattern.permute.xlu1 %v1112_v43 }
 0x21d   : > { %s919_s19 = spop %918 }
 0x21e   : > { %v467_v23 = vstv %s919_s19 }
 0x21f   : > { %v468_v24 = vmul.f32 %v467_v23, %v1255_v1  ;;  %v469_v27 = vmul.f32 %v467_v23, %v1260_v3 }
 0x221   : > { %v471_v26 = vmul.f32 %v470_v25, %v468_v24  ;;  %v472_v30 = vmul.f32 %v470_v25, %v469_v27 }
 0x223   : > { %475 = vrot.lane.b32.xlu2 %v471_v26, %s1109_s9 }
 0x226   : > { %v369_v28 = vpop.permute.xlu0 %368 }
 0x227   : > { %v373_v29 = vsub.f32 %v1260_v3, %v369_v28 }
 0x229   : > { %393 = vperm.xlu0 %1000, %v373_v29  }
 0x22b   : > { %477 = vrot.lane.b32.xlu2 %v472_v30, %s1109_s9 }
 0x22e   : > { %v382_v39 = vpop.permute.xlu0 %381 }
 0x22f   : > { %v385_v40 = vmul.f32 %v382_v39, %v1230_v10 }
 0x231   : > { %1004 = vset.pattern.permute.xlu0 %v1113_v44 }
 0x233   : > { %376 = vperm.xlu2 %997, %v359_v5  }
 0x23b   : > { %485 = vperm.xlu2 %997, %v468_v24   ;;  %v584_v24 = vstv %s899_s14 }
 0x243   : > { %490 = vperm.xlu2 %997, %v469_v27  }
 0x24b   : > { %1001 = vset.pattern.permute.xlu2 %v1110_v20 }
 0x27d   : > { %v476_v31 = vpop.permute.xlu2 %475 }
 0x27e   : > { %v481_v32 = vsub.f32 %v1255_v1, %v476_v31 }
 0x280   : > { %497 = vperm.xlu2 %1001, %v481_v32  }
 0x283   : > { %v389_v37 = vpop.permute.xlu1 %388 }
 0x285   : > { %v478_v33 = vpop.permute.xlu2 %477 }
 0x286   : > { %v482_v34 = vsub.f32 %v1260_v3, %v478_v33 }
 0x288   : > { %502 = vperm.xlu2 %1001, %v482_v34  }
 0x28d   : > { %v377_v35 = vpop.permute.xlu2 %376 }
 0x28e   : > { %v384_v36 = vmul.f32 %v377_v35, %v1223_v6 }
 0x290   : > { %v396_v38 = vadd.f32 %v389_v37, %v384_v36  ;;  %1002 = vset.pattern.permute.xlu2 %v1112_v43 }
 0x292   : > { %400 = vrot.lane.b32.xlu0 %v396_v38, %s1111_s20 }
 0x295   : > { %v486_v45 = vpop.permute.xlu2 %485 }
 0x296   : > { %v493_v49 = vmul.f32 %v486_v45, %v1223_v6 }
 0x29b   : > { %v394_v41 = vpop.permute.xlu0 %393 }
 0x29c   : > { %v397_v42 = vadd.f32 %v394_v41, %v385_v40 }
 0x29d   : > { %v491_v46 = vpop.permute.xlu2 %490 }
 0x29e   : > { %402 = vrot.lane.b32.xlu2 %v397_v42, %s1111_s20  ;;  %v494_v52 = vmul.f32 %v491_v46, %v1230_v10 }
 0x2a6   : > { %536 = vperm.xlu2 %1002, %v1255_v1  }
 0x2ae   : > { %1005 = vset.pattern.permute.xlu2 %v1113_v44 }
 0x2af   : > { %560 = vperm.xlu2 %1005, %v1260_v3  }
 0x2b7   : > { %1006 = vset.pattern.permute.xlu2 %v1115_v48 }
 0x2b8   : > { %522 = vperm.xlu2 %1006, %v1255_v1  }
 0x2da   : > { %v498_v50 = vpop.permute.xlu2 %497 }
 0x2db   : > { %v505_v51 = vadd.f32 %v498_v50, %v493_v49 }
 0x2dd   : > { %509 = vrot.lane.b32.xlu1 %v505_v51, %s1111_s20 }
 0x2e2   : > { %v503_v53 = vpop.permute.xlu2 %502 }
 0x2e3   : > { %v506_v54 = vadd.f32 %v503_v53, %v494_v52 }
 0x2e5   : > { %540 = vperm.xlu1 %1003, %v1260_v3   ;;  %511 = vrot.lane.b32.xlu0 %v506_v54, %s1111_s20 }
 0x2ed   : > { %567 = vrot.lane.b32.xlu1 %v565_v56, %s1116_s11  ;;  %556 = vperm.xlu0 %1004, %v1255_v1  }
 0x2ee   : > { %1007 = vset.pattern.permute.xlu1 %v1115_v48 }
 0x2f5   : > { %527 = vperm.xlu1 %1007, %v1260_v3  }
 0x2f8   : > { %v403_v6 = vpop.permute.xlu2 %402 }
 0x2f9   : > { %408 = vst.msk [vmem:[#allocation2 + $0x8] sm:$0xff] %vm406_vm12, %v403_v6 }
 0x300   : > { %v537_v58 = vpop.permute.xlu2 %536 }
 0x304   : > { %v401_v10 = vpop.permute.xlu0 %400 }
 0x305   : > { %407 = vst.msk [vmem:[#allocation2] sm:$0xff] %vm406_vm12, %v401_v10 }
 0x309   : > { %v561_v63 = vpop.permute.xlu2 %560 }
 0x312   : > { %v523_v13 = vpop.permute.xlu2 %522 }
 0x34f   : > { %v510_v57 = vpop.permute.xlu1 %509 }
 0x350   : > { %516 = vst.msk [vmem:[#allocation2] sm:$0xff] %vm515_vm13, %v510_v57 }
 0x357   : > { %v541_v59 = vpop.permute.xlu1 %540  ;;  %v518_v60 = vld [vmem:[#allocation2] sm:$0xff]  ;;  %v512_v61 = vpop.permute.xlu0 %511 }
 0x358   : > { %517 = vst.msk [vmem:[#allocation2 + $0x8] sm:$0xff] %vm515_vm13, %v512_v61  ;;  %v543_v62 = vmul.f32 %v537_v58, %v518_v60  ;;  %v530_v16 = vmul.f32 %v523_v13, %v518_v60 }
 0x35a   : > { %547 = vrot.lane.b32.xlu0 %v543_v62, %s1117_s12  ;;  %v533_v21 = vmul.f32 %v532_v18, %v530_v16 }
 0x35f   : > { %v519_v0 = vld [vmem:[#allocation2 + $0x8] sm:$0xff]  ;;  %v557_v4 = vpop.permute.xlu0 %556  ;;  %v568_v9 = vpop.permute.xlu1 %567 }
 0x360   : > { %v564_v5 = vmul.f32 %v561_v63, %v519_v0  ;;  %v563_v7 = vmul.f32 %v557_v4, %v518_v60  ;;  %v544_v8 = vmul.f32 %v541_v59, %v519_v0 }
 0x362   : > { %v571_v11 = vmul.f32 %v568_v9, %v564_v5  ;;  %v570_v12 = vmul.f32 %v568_v9, %v563_v7  ;;  %549 = vrot.lane.b32.xlu2 %v544_v8, %s1117_s12 }
 0x364   : > { %576 = vrot.lane.b32.xlu0 %v571_v11, %s1118_s13  ;;  %574 = vrot.lane.b32.xlu1 %v570_v12, %s1118_s13  ;;  %v1119_v12 = vmov 2  }
 0x365   : > { %1008 = vset.pattern.permute.xlu0 %v1119_v12  ;;  %1009 = vset.pattern.permute.xlu1 %v1119_v12 }
 0x366   : > { %1010 = vset.pattern.permute.xlu2 %v1119_v12  ;;  %v265_v12 = vld [vmem:[%s1391_s3] sm:$0xff] }
 0x367   : > { %v528_v14 = vpop.permute.xlu1 %527 }
 0x368   : > { %v531_v17 = vmul.f32 %v528_v14, %v519_v0 }
 0x36a   : > { %v534_v20 = vmul.f32 %v532_v18, %v531_v17 }
 0x3bc   : > { %v550_v19 = vpop.permute.xlu2 %549 }
 0x3bd   : > { %v554_v22 = vadd.f32 %v550_v19, %v534_v20 }
 0x3cc   : > { %v548_v15 = vpop.permute.xlu0 %547 }
 0x3cd   : > { %v553_v23 = vadd.f32 %v548_v15, %v533_v21 }
 0x3d6   : > { %v575_v25 = vpop.permute.xlu1 %574  ;;  %v577_v26 = vpop.permute.xlu0 %576 }
 0x3d7   : > { %v580_v27 = vadd.f32 %v575_v25, %v553_v23  ;;  %v581_v28 = vadd.f32 %v577_v26, %v554_v22 }
 0x3d9   : > { %vm582_vm14 = vcmp.gt.f32.partialorder %v580_v27, 0.0  ;;  %v585_v29 = vmul.f32 %v584_v24, %v580_v27  ;;  %vm583_vm15 = vcmp.gt.f32.partialorder %v581_v28, 0.0  ;;  %v586_v30 = vmul.f32 %v584_v24, %v581_v28 }
 0x3db   : > { %v1298_v31 = vsel %vm582_vm14, %v580_v27, %v585_v29  ;;  %v1300_v32 = vsel %vm583_vm15, %v581_v28, %v586_v30 }
 0x3dc   : > { %677 = vrot.lane.b32.xlu0 %v1298_v31, %s1106_s29  ;;  %v589_v33 = vsel %vm313_vm3, %v1298_v31, 0.0  ;;  %v590_v34 = vsel %vm313_vm3, %v1300_v32, 0.0  ;;  %v601_v35 = vmul.f32 %v1298_v31, %v1298_v31  ;;  %v602_v36 = vmul.f32 %v1300_v32, %v1300_v32 }
 0x3dd   : > { %v591_v37 = vadd.f32 %v590_v34, %v589_v33 }
 0x3de   : > { %v603_v38 = vsel %vm313_vm3, %v601_v35, 0.0  ;;  %v604_v39 = vsel %vm313_vm3, %v602_v36, 0.0 }
 0x3df   : > { %592 = vadd.xlane.f32.xlu2 %v591_v37  ;;  %v605_v40 = vadd.f32 %v604_v39, %v603_v38 }
 0x3e1   : > { %606 = vadd.xlane.f32.xlu1 %v605_v40 }
 0x3e4   : > { %679 = vrot.lane.b32.xlu0 %v1300_v32, %s1106_s29 }
 0x3ec   : > { %697 = vrot.lane.b32.xlu0 %v601_v35, %s1106_s29 }
 0x3f4   : > { %699 = vrot.lane.b32.xlu0 %v602_v36, %s1106_s29 }
 0x44e   : > { %v678_v41 = vpop.permute.xlu0 %677 }
 0x44f   : > { %v683_v48 = vsel %vm313_vm3, %v678_v41, 0.0 }
 0x452   : > { %v593_v42 = vpop.xlane.xlu2 %592 }
 0x453   : > { %v594_v43 = vrot.slane %v593_v42, 4 }
 0x454   : > { %v607_v44 = vpop.xlane.xlu1 %606 }
 0x455   : > { %v595_v45 = vadd.f32 %v594_v43, %v593_v42  ;;  %v608_v46 = vrot.slane %v607_v44, 4  ;;  %v1120_v43 = vmov 3  }
 0x456   : > { %v680_v47 = vpop.permute.xlu0 %679 }
 0x457   : > { %v596_v49 = vrot.slane %v595_v45, 2  ;;  %v609_v50 = vadd.f32 %v608_v46, %v607_v44  ;;  %v684_v51 = vsel %vm313_vm3, %v680_v47, 0.0 }
 0x458   : > { %v685_v52 = vadd.f32 %v684_v51, %v683_v48 }
 0x459   : > { %v610_v53 = vrot.slane %v609_v50, 2  ;;  %v597_v54 = vadd.f32 %v596_v49, %v595_v45 }
 0x45a   : > { %686 = vadd.xlane.f32.xlu0 %v685_v52 }
 0x45b   : > { %v598_v55 = vrot.slane %v597_v54, 1  ;;  %v611_v56 = vadd.f32 %v610_v53, %v609_v50 }
 0x45d   : > { %v599_v6 = vadd.f32 %v598_v55, %v597_v54  ;;  %v612_v10 = vrot.slane %v611_v56, 1 }
 0x45e   : > { %v698_v57 = vpop.permute.xlu0 %697 }
 0x45f   : > { %920 = vpush %v599_v6  ;;  %v613_v58 = vadd.f32 %v612_v10, %v611_v56  ;;  %v703_v60 = vsel %vm313_vm3, %v698_v57, 0.0 }
 0x461   : > { %922 = vpush %v613_v58 }
 0x466   : > { %v700_v59 = vpop.permute.xlu0 %699 }
 0x467   : > { %v704_v61 = vsel %vm313_vm3, %v700_v59, 0.0 }
 0x468   : > { %v705_v62 = vadd.f32 %v704_v61, %v703_v60 }
 0x46a   : > { %706 = vadd.xlane.f32.xlu2 %v705_v62 }
 0x490   : > { %s921_s29 = spop %920 }
 0x491   : > { %s1322_s16 = smul.f32 0.001953125, %s921_s29 }
 0x492   : > { %s923_s17 = spop %922 }
 0x493   : > { %s617_s18 = smul.f32 %s1322_s16, %s1322_s16  ;;  %v636_v25 = vstv %s1322_s16 }
 0x494   : > { %s616_s10 = smul.f32 0.001953125, %s923_s17 }
 0x496   : > { %s618_s19 = ssub.f32 %s616_s10, %s617_s18 }
 0x498   : > { %s619_s20 = smax.f32 %s1107_s15, %s618_s19  ;;  %s254_s19 = sand.u32 1, %s1095_s22  }
 0x499   : > { %s620_s26 = sadd.f32 1e-08, %s619_s20  ;;  %s897_s20 = sshll.u32 %s254_s19, 3 }
 0x49b   : > { %v621_v63 = vstv %s620_s26  ;;  %s904_s26 = sshll.u32 %s1177_s25, 3 }
 0x49c   : > { %1018 = vrsqrt.f32 %v621_v63  ;;  %vm628_vm1 = vweird.f32 %v621_v63 }
 0x4a2   : > { %v1019_v0 = vpop.eup %1018 }
 0x4a3   : > { %v623_v4 = vmul.f32 %v1019_v0, %v621_v63  ;;  %vm629_vm0 = vweird.f32 %v1019_v0 }
 0x4a4   : > { %vm630_vm2 = vmor %vm628_vm1, %vm629_vm0 }
 0x4a5   : > { %v624_v5 = vmul.f32 %v1019_v0, %v623_v4 }
 0x4a7   : > { %v625_v7 = vmul.f32 0.5, %v624_v5 }
 0x4a9   : > { %v626_v8 = vsub.f32 1.5, %v625_v7 }
 0x4ab   : > { %v627_v9 = vmul.f32 %v1019_v0, %v626_v8 }
 0x4ad   : > { %v631_v11 = vsel %vm630_vm2, %v1019_v0, %v627_v9 }
 0x4ae   : > { %924 = vpush %v631_v11 }
 0x4cd   : > { %v687_v13 = vpop.xlane.xlu0 %686 }
 0x4ce   : > { %v688_v14 = vrot.slane %v687_v13, 4 }
 0x4d0   : > { %v689_v15 = vadd.f32 %v688_v14, %v687_v13 }
 0x4d2   : > { %v690_v16 = vrot.slane %v689_v15, 2 }
 0x4d4   : > { %v691_v17 = vadd.f32 %v690_v16, %v689_v15 }
 0x4d6   : > { %v692_v18 = vrot.slane %v691_v17, 1 }
 0x4d8   : > { %v693_v19 = vadd.f32 %v692_v18, %v691_v17 }
 0x4da   : > { %926 = vpush %v693_v19 }
 0x4dd   : > { %v707_v20 = vpop.xlane.xlu2 %706 }
 0x4de   : > { %v708_v21 = vrot.slane %v707_v20, 4 }
 0x4df   : > { %s925_s28 = spop %924 }
 0x4e0   : > { %v709_v22 = vadd.f32 %v708_v21, %v707_v20  ;;  %v633_v23 = vstv %s925_s28 }
 0x4e1   : > { %v635_v24 = vmul.f32 %v633_v23, %v1260_v3  ;;  %v634_v30 = vmul.f32 %v633_v23, %v1255_v1 }
 0x4e2   : > { %v710_v26 = vrot.slane %v709_v22, 2 }
 0x4e3   : > { %v638_v27 = vmul.f32 %v636_v25, %v635_v24  ;;  %656 = vperm.xlu0 %1008, %v635_v24   ;;  %v637_v34 = vmul.f32 %v636_v25, %v634_v30 }
 0x4e4   : > { %v711_v28 = vadd.f32 %v710_v26, %v709_v22 }
 0x4e5   : > { %643 = vrot.lane.b32.xlu1 %v638_v27, %s1109_s9 }
 0x4e6   : > { %v712_v29 = vrot.slane %v711_v28, 1 }
 0x4e8   : > { %v713_v33 = vadd.f32 %v712_v29, %v711_v28 }
 0x4ea   : > { %928 = vpush %v713_v33 }
 0x4eb   : > { %1013 = vset.pattern.permute.xlu0 %v1120_v43 }
 0x4ed   : > { %641 = vrot.lane.b32.xlu1 %v637_v34, %s1109_s9 }
 0x50b   : > { %s927_s11 = spop %926 }
 0x50c   : > { %s1332_s12 = smul.f32 0.001953125, %s927_s11 }
 0x50e   : > { %s717_s13 = smul.f32 %s1332_s12, %s1332_s12  ;;  %v736_v46 = vstv %s1332_s12  ;;  %s815_s12 = scalar_lea.hbm %s1394_s6, %s904_s26 }
 0x51b   : > { %s929_s14 = spop %928 }
 0x51c   : > { %s716_s29 = smul.f32 0.001953125, %s929_s14 }
 0x51e   : > { %s718_s16 = ssub.f32 %s716_s29, %s717_s13  ;;  %s256_s13 = scalar_lea.vmem [#allocation7], %s897_s20 }
 0x51f   : > { %s817_s14 = sshll.u32 %s256_s13, 4  ;;  %s819_s29 = sshll.u32 %s815_s12, 4  ;;  %s818_s14 = int_to_ptr.vmem [resolvable:$true] %s817_s14  ;;  %s820_s29 = int_to_ptr.hbm [resolvable:$true] %s819_s29 }
 0x520   : > { %s719_s17 = smax.f32 %s1107_s15, %s718_s16  ;;  %s805_s16 = scalar_lea.sflag [#allocation5], %s254_s19 }
 0x521   : > { %s720_s18 = sadd.f32 1e-08, %s719_s17  ;;  %s1051_s17 = sshra.s32 %s820_s29, 4  ;;  %s1052_s17 = int_to_ptr.hbm [resolvable:$true] %s1051_s17 }
 0x522   : > { %s1057_s15 = scalar_lea.hbm %s1394_s6, 16  ;;  %p1058_p3 = scmp.lt.s32.totalorder %s1052_s17, %s1394_s6 }
 0x523   : > { %v721_v35 = vstv %s720_s18  ;;  %s1053_s18 = scalar_lea.hbm %s1052_s17, 8 }
 0x524   : > { %1020 = vrsqrt.f32 %v721_v35  ;;  %vm728_vm5 = vweird.f32 %v721_v35  ;;  %p1054_p0 = scmp.ne.s32.totalorder %s1052_s17, %s1053_s18  ;;  %p1059_p4 = scmp.lt.s32.totalorder %s1057_s15, %s1053_s18 }
 0x526   : > { %p1055_p1 = pnand %p1054_p0, %p1194_p5  ;;  %p1060_p7 = por %p1059_p4, %p1058_p3 }
 0x528   : > { %p1056_p2 = pneg %p1055_p1 }
 0x52a   : > { %v1021_v36 = vpop.eup %1020  ;;  %p1061_p8 = pnand %p1060_p7, %p1056_p2 }
 0x52b   : > { %v723_v37 = vmul.f32 %v1021_v36, %v721_v35  ;;  %vm729_vm4 = vweird.f32 %v1021_v36 }
 0x52c   : > { %vm730_vm6 = vmor %vm728_vm5, %vm729_vm4 }
 0x52d   : > { %v724_v38 = vmul.f32 %v1021_v36, %v723_v37 }
 0x52f   : > { %v725_v39 = vmul.f32 0.5, %v724_v38 }
 0x531   : > { %v726_v40 = vsub.f32 1.5, %v725_v39 }
 0x533   : > { %v727_v41 = vmul.f32 %v1021_v36, %v726_v40 }
 0x535   : > { %v731_v42 = vsel %vm730_vm6, %v1021_v36, %v727_v41 }
 0x536   : > { %930 = vpush %v731_v42 }
 0x555   : > { %v657_v59 = vpop.permute.xlu0 %656 }
 0x556   : > { %v660_v60 = vmul.f32 %v657_v59, %v1300_v32 }
 0x557   : > { %v644_v48 = vpop.permute.xlu1 %643 }
 0x558   : > { %v648_v50 = vsub.f32 %v1260_v3, %v644_v48 }
 0x55f   : > { %v642_v52 = vpop.permute.xlu1 %641 }
 0x560   : > { %v647_v53 = vsub.f32 %v1255_v1, %v642_v52 }
 0x567   : > { %s931_s10 = spop %930 }
 0x568   : > { %v733_v44 = vstv %s931_s10 }
 0x569   : > { %v735_v45 = vmul.f32 %v733_v44, %v1260_v3  ;;  %v734_v49 = vmul.f32 %v733_v44, %v1255_v1 }
 0x56b   : > { %v738_v47 = vmul.f32 %v736_v46, %v735_v45  ;;  %756 = vperm.xlu1 %1009, %v735_v45   ;;  %v737_v51 = vmul.f32 %v736_v46, %v734_v49 }
 0x56d   : > { %743 = vrot.lane.b32.xlu2 %v738_v47, %s1109_s9 }
 0x573   : > { %1011 = vset.pattern.permute.xlu1 %v1120_v43 }
 0x574   : > { %668 = vperm.xlu1 %1011, %v648_v50  }
 0x575   : > { %741 = vrot.lane.b32.xlu2 %v737_v51, %s1109_s9 }
 0x57d   : > { %651 = vperm.xlu2 %1010, %v634_v30  }
 0x585   : > { %751 = vperm.xlu2 %1010, %v734_v49  }
 0x58d   : > { %1012 = vset.pattern.permute.xlu2 %v1120_v43 }
 0x58e   : > { %663 = vperm.xlu2 %1012, %v647_v53  }
 0x5c7   : > { %v744_v54 = vpop.permute.xlu2 %743 }
 0x5c8   : > { %v748_v55 = vsub.f32 %v1260_v3, %v744_v54 }
 0x5ca   : > { %768 = vperm.xlu1 %1011, %v748_v55  }
 0x5cf   : > { %v742_v56 = vpop.permute.xlu2 %741 }
 0x5d0   : > { %v747_v6 = vsub.f32 %v1255_v1, %v742_v56 }
 0x5d2   : > { %763 = vperm.xlu1 %1011, %v747_v6  }
 0x5d7   : > { %v652_v10 = vpop.permute.xlu2 %651 }
 0x5d8   : > { %v659_v62 = vmul.f32 %v652_v10, %v1298_v31 }
 0x5dd   : > { %v757_v57 = vpop.permute.xlu1 %756 }
 0x5de   : > { %v760_v3 = vmul.f32 %v757_v57, %v1300_v32 }
 0x5df   : > { %v752_v58 = vpop.permute.xlu2 %751 }
 0x5e0   : > { %v759_v7 = vmul.f32 %v752_v58, %v1298_v31 }
 0x5e6   : > { %v669_v61 = vpop.permute.xlu1 %668 }
 0x5e7   : > { %v672_v63 = vadd.f32 %v669_v61, %v660_v60 }
 0x5e8   : > { %v664_v0 = vpop.permute.xlu2 %663 }
 0x5e9   : > { %674 = vst.msk [vmem:[#allocation3 + $0x8] sm:$0xff] %vm313_vm3, %v672_v63  ;;  %v671_v4 = vadd.f32 %v664_v0, %v659_v62 }
 0x5eb   : > { %673 = vst.msk [vmem:[#allocation3] sm:$0xff] %vm313_vm3, %v671_v4  ;;  %vm778_vm3 = vcmask 130048  }
 0x63c   : > { %v769_v1 = vpop.permute.xlu1 %768 }
 0x63d   : > { %v772_v5 = vadd.f32 %v769_v1, %v760_v3 }
 0x63f   : > { %775 = vst.msk [vmem:[#allocation3 + $0x8] sm:$0xff] %vm773_vm7, %v772_v5 }
 0x644   : > { %v764_v8 = vpop.permute.xlu1 %763 }
 0x645   : > { %v771_v9 = vadd.f32 %v764_v8, %v759_v7 }
 0x646   : > { %v777_v11 = vld [vmem:[#allocation3 + $0x8] sm:$0xff] }
 0x647   : > { %774 = vst.msk [vmem:[#allocation3] sm:$0xff] %vm773_vm7, %v771_v9  ;;  %796 = vmatpush.msra.mxu1 %v777_v11 }
 0x64e   : > { %v776_v13 = vld [vmem:[#allocation3] sm:$0xff] }
 0x64f   : > { %797 = vmatpush.msra.mxu1 %v776_v13 }
 0x650   : > { %902 = vmatmul.msk.f32.vlgmr.msra.gmra.mxu1 %vm778_vm3, %v265_v12 }
 0x6cd   : > { %v799_v31 = vpop.f32.mrf.mxu1 }
 0x6ce   : > { %v800_v32 = vadd.f32 %v799_v31, %v1219_v2 }
 0x6d0   : > { %803 = vst.msk [vmem:[%s256_s13] sm:$0xff] %vm802_vm8, %v800_v32 }
 0x6d1   : > { %1064 = shalt.err (!%p1061_p8)
}
 0x6d2   : > { %936 = dma.vmem_to_hbm [thread:$0]  (%p1194_p5), %s818_s14, 128, %s820_s29, %s805_s16  }
 0x6d3 PF: > { %p948_p9 = scmp.ge.s32.totalorder %s1103_s24, 2  ;;  %s831_s19 = sand.u32 1, %s1091_s21  }
 0x6d4   : > { %s832_s26 = scalar_lea.sflag [#allocation5], %s831_s19 }
 0x6d5   : > { %p943_p10 = pnand %p948_p9, %p1198_p6 }
 0x6d7   : > { %p944_p11 = pneg %p943_p10 }
 0x6d9   : > { %1086 = dma.done.wait (%p944_p11), %s832_s26, 128  }
 0x6da   : > { %1088 = vsyncadd (%p944_p11), %s832_s26, 4294967168  ;;  %p17_p12 = scmp.ge.s32.totalorder %s1181_s27, 4   ;;  %s1397_s21 = smov %s1095_s22 }
 0x6db   : > { %s1398_s22 = smov %s1099_s23  ;;  %s1399_s23 = smov %s1192_s30 }
 0x6dc   : > { %s1400_s24 = smov %s1181_s27  ;;  %19 = sbr.rel (!%p17_p12) target bundleno = 4 (0x4), region = 84 }
 0x6e1   :  { %838 = vsyncpa [#allocation5], 1 }
 0x6e2   :  { %840 = vsyncpa [#allocation5 + $0x1], 1 }
 0x6e3   :  { %841 = vsyncpa [#allocation6], 1 }
 0x6e4   :  { %843 = vsyncpa [#allocation6 + $0x1], 1 }

</bundles_post_ra>
